<compile_context>
chip_gen: v7x
topology: tpu7x:2x2x1
jax: 0.10.0
libtpu: 0.0.40
codegen_flags: <defaults>
</compile_context>

<pallas_src>
import jax
import jax.numpy as jnp
from jax.experimental import pallas as pl
from jax.experimental.pallas import tpu as pltpu

_OUT_PAD = 128                        # lane-dense padded output width
_VMEM_TARGET = 38 * 1024 * 1024       # v7x-safe resident-bytes target (64 MiB physical)
_VMEM_LIMIT = 48 * 1024 * 1024        # scoped VMEM limit (v5e default is only 16 MiB)


def _round_up(x, m):
    return ((x + m - 1) // m) * m


def _pool_fc_kernel(h_ref, m_ref, w_ref, out_ref, acc_ref):
    # h_ref:   (bB, tS, H)   hidden states, input dtype (f32 or bf16)
    # m_ref:   (bB, tS, 1)   raw {0,1} attention mask, same dtype as h
    # w_ref:   (H, 128)      f32, zero-padded fc weight
    # out_ref: (bB, 128)     f32, un-normalized logits ((masked sum) @ W)
    # acc_ref: (bB, H)       f32 running masked sum (persists across the S axis)
    s_idx = pl.program_id(1)

    @pl.when(s_idx == 0)
    def _init():
        acc_ref[...] = jnp.zeros_like(acc_ref)

    # Mask is {0,1} in the input dtype, so the product is exact; accumulate in f32.
    # TODO(synk): on v7x the bf16 masked reduce could move to the idle MXU (batched dot)
    # to relieve VALU; kept on the VPU here for robust lowering at arbitrary shapes.
    prod = h_ref[...] * m_ref[...]
    acc_ref[...] += jnp.sum(prod.astype(jnp.float32), axis=1)

    @pl.when(s_idx == pl.num_programs(1) - 1)
    def _finalize():
        # (sum_s m*h) @ W ; the 1/len scale and the bias are folded in by the wrapper.
        out_ref[...] = jnp.dot(acc_ref[...], w_ref[...],
                               preferred_element_type=jnp.float32)


def _pick_block_b(B):
    """Divisor of B, multiple of 8 when possible, >= 2 tiles when B >= 16 (megacore)."""
    upper = 32
    if B >= 16:
        upper = min(upper, B // 2)
    for cand in range(min(upper, B), 0, -1):
        if B % cand == 0 and (cand % 8 == 0 or cand == B):
            return cand
    return B


def _pick_tile_s(S, H, block_b, itemsize):
    """Sequence tile: aligned divisor of S within the VMEM budget; full S if it fits;
    zero-padding of the activations (extra HBM traffic) only as a last resort."""
    align = 16 if itemsize < 4 else 8
    # Resident VMEM per sequence row of a tile (conservative):
    #   2x double-buffered h rows, f32 elementwise temporaries (upcast/product liveness),
    #   2x double-buffered mask rows padded out to 128 lanes.
    temp_f32_copies = 2 if itemsize < 4 else 1
    per_row = block_b * (2 * H * itemsize
                         + temp_f32_copies * H * 4
                         + 2 * 128 * itemsize)
    fixed = (2 * H * _OUT_PAD * 4                         # fc weight (double-buffered)
             + _round_up(block_b, 8) * H * 4              # f32 accumulator
             + 2 * _round_up(block_b, 8) * _OUT_PAD * 4)  # output blocks
    max_ts = max(align, (_VMEM_TARGET - fixed) // max(per_row, 1))
    cap = min(S, max_ts)

    # Largest aligned divisor of S that is not too small (>= cap/4): no padding needed.
    floor = max(align, cap // 4)
    start = (cap // align) * align
    for cand in range(start, floor - 1, -align):
        if S % cand == 0:
            return cand, S
    # Whole sequence as a single tile (block dims equal to the full array are legal).
    if S <= cap:
        return S, S
    # Last resort: pad the sequence (wrapper zero-pads both h and mask).
    tile_s = max(align, start)
    return tile_s, _round_up(S, tile_s)


def custom_model_head(last_hidden_state, attention_mask, fc_weight, fc_bias):
    """last_hidden_state: (B, S, H) f32/bf16; attention_mask: (B, S) numeric;
    fc_weight: (H, OUT) (PyTorch fc.weight transposed); fc_bias: (OUT,) -> (B, OUT) f32."""
    B, S, H = last_hidden_state.shape
    OUT = fc_weight.shape[1]
    in_dtype = last_hidden_state.dtype
    itemsize = jnp.dtype(in_dtype).itemsize

    block_b = _pick_block_b(B)
    tile_s, s_pad = _pick_tile_s(S, H, block_b, itemsize)

    # Raw {0,1} mask in the hidden-state dtype (exact; half the footprint for bf16).
    mask_in = attention_mask.astype(in_dtype)[:, :, None]

    h_in = last_hidden_state
    if s_pad != S:  # last-resort path only; padded rows have zero mask and zero data.
        h_in = jnp.pad(h_in, ((0, 0), (0, s_pad - S), (0, 0)))
        mask_in = jnp.pad(mask_in, ((0, 0), (0, s_pad - S), (0, 0)))

    # Lane-dense (128-wide) zero-padded fc weight.
    w_pad = jnp.zeros((H, _OUT_PAD), jnp.float32).at[:, :OUT].set(
        fc_weight.astype(jnp.float32))

    grid = (B // block_b, s_pad // tile_s)

    cost = pl.CostEstimate(
        flops=2 * B * s_pad * H + 2 * B * H * _OUT_PAD,
        transcendentals=0,
        bytes_accessed=(B * s_pad * H + B * s_pad) * itemsize
                       + H * _OUT_PAD * 4 + B * _OUT_PAD * 4)

    out_pad = pl.pallas_call(
        _pool_fc_kernel,
        out_shape=jax.ShapeDtypeStruct((B, _OUT_PAD), jnp.float32),
        grid_spec=pltpu.PrefetchScalarGridSpec(
            num_scalar_prefetch=0,
            grid=grid,
            in_specs=[
                pl.BlockSpec((block_b, tile_s, H), lambda i, j: (i, j, 0)),
                pl.BlockSpec((block_b, tile_s, 1), lambda i, j: (i, j, 0)),
                pl.BlockSpec((H, _OUT_PAD), lambda i, j: (0, 0)),
            ],
            out_specs=pl.BlockSpec((block_b, _OUT_PAD), lambda i, j: (i, 0)),
            scratch_shapes=[pltpu.VMEM((block_b, H), jnp.float32)],
        ),
        compiler_params=pltpu.CompilerParams(
            dimension_semantics=("parallel", "arbitrary"),
            vmem_limit_bytes=_VMEM_LIMIT,
        ),
        cost_estimate=cost,
    )(h_in, mask_in, w_pad)

    # mean = sum / clamp(len, 1e-9); logits = mean @ W + b == (sum @ W) / len + b.
    denom = jnp.maximum(jnp.sum(attention_mask.astype(jnp.float32), axis=1), 1e-9)
    return out_pad[:, :OUT] / denom[:, None] + fc_bias.astype(jnp.float32)[None, :]


def _reference(last_hidden_state, attention_mask, fc_weight, fc_bias):
    m = attention_mask.astype(jnp.float32)[:, :, None]
    s = jnp.sum(last_hidden_state.astype(jnp.float32) * m, axis=1)
    d = jnp.maximum(jnp.sum(m, axis=1), 1e-9)
    mean = s / d
    return mean @ fc_weight + fc_bias


if __name__ == "__main__":
    B, S, H, OUT = 2, 8, 32, 6

    key = jax.random.PRNGKey(0)
    k_h, k_m, k_w = jax.random.split(key, 3)

    # Synthetic "last_hidden_state" standing in for the transformer backbone output.
    last_hidden_state = jax.random.normal(k_h, (B, S, H), dtype=jnp.float32)

    # Attention mask: first few tokens valid, rest padding (deterministic pattern).
    lengths = jnp.array([6, 4], dtype=jnp.int32)
    attention_mask = (jnp.arange(S)[None, :] < lengths[:, None]).astype(jnp.int32)

    # fc parameters, initialized like _init_weights: normal(0, initializer_range), zero bias.
    initializer_range = 0.02
    fc_weight = initializer_range * jax.random.normal(k_w, (H, OUT), dtype=jnp.float32)
    fc_bias = jnp.zeros((OUT,), dtype=jnp.float32)

    # f32 path
    out = custom_model_head(last_hidden_state, attention_mask, fc_weight, fc_bias)
    out = jax.block_until_ready(out)
    ref = _reference(last_hidden_state, attention_mask, fc_weight, fc_bias)
    assert out.shape == (B, OUT)
    assert jnp.allclose(out, ref, atol=1e-5, rtol=1e-5), (out, ref)

    # bf16 streaming path (backbone output dtype) with in-kernel f32 accumulation.
    h_bf16 = last_hidden_state.astype(jnp.bfloat16)
    out_bf = custom_model_head(h_bf16, attention_mask, fc_weight, fc_bias)
    out_bf = jax.block_until_ready(out_bf)
    ref_bf = _reference(h_bf16, attention_mask, fc_weight, fc_bias)
    assert jnp.allclose(out_bf, ref_bf, atol=1e-4, rtol=1e-4), (out_bf, ref_bf)

    print("KERNEL_OK")
</pallas_src>

<mosaic_0001>
module attributes {stable_mosaic.version = 11 : i64} {
  func.func @_pool_fc_kernel(%arg0: i32, %arg1: i32, %arg2: memref<2x8x32xf32, #tpu.memory_space<vmem>>, %arg3: memref<2x8x1xf32, #tpu.memory_space<vmem>>, %arg4: memref<32x128xf32, #tpu.memory_space<vmem>>, %arg5: memref<2x128xf32, #tpu.memory_space<vmem>>, %arg6: memref<2x32xf32, #tpu.memory_space<vmem>>) attributes {dimension_semantics = [#tpu.dimension_semantics<parallel>, #tpu.dimension_semantics<arbitrary>], iteration_bounds = array<i64: 1, 1>, scalar_prefetch = 0 : i64, scratch_operands = 1 : i64, tpu.core_type = #tpu.core_type<tc>, window_params = [{transform_indices = @transform_0, window_bounds = array<i64: 2, 8, 32>}, {transform_indices = @transform_1, window_bounds = array<i64: 2, 8, 1>}, {pipeline_mode = #tpu.pipeline_mode<synchronous>, transform_indices = @transform_2, window_bounds = array<i64: 32, 128>}, {transform_indices = @transform_3, window_bounds = array<i64: 2, 128>}]} {
    %c0_i32 = arith.constant 0 : i32
    %0 = arith.cmpi eq, %arg1, %c0_i32 : i32
    %1 = arith.extui %0 : i1 to i32
    %c0_i32_0 = arith.constant 0 : i32
    %2 = arith.cmpi ne, %1, %c0_i32_0 : i32
    scf.if %2 {
      %cst_12 = arith.constant 0.000000e+00 : f32
      %14 = vector.broadcast %cst_12 : f32 to vector<2x32xf32>
      %c0_13 = arith.constant 0 : index
      %c0_14 = arith.constant 0 : index
      %15 = vector.load %arg6[%c0_13, %c0_14] : memref<2x32xf32, #tpu.memory_space<vmem>>, vector<2x32xf32>
      tpu.vector_store %arg6[%c0_13, %c0_14], %14 {strides = array<i32>} : memref<2x32xf32, #tpu.memory_space<vmem>>, vector<2x32xf32>,
    } else {
    }
    %c0 = arith.constant 0 : index
    %c0_1 = arith.constant 0 : index
    %c0_2 = arith.constant 0 : index
    %3 = vector.load %arg2[%c0, %c0_1, %c0_2] : memref<2x8x32xf32, #tpu.memory_space<vmem>>, vector<2x8x32xf32>
    %c0_3 = arith.constant 0 : index
    %c0_4 = arith.constant 0 : index
    %c0_5 = arith.constant 0 : index
    %4 = vector.load %arg3[%c0_3, %c0_4, %c0_5] : memref<2x8x1xf32, #tpu.memory_space<vmem>>, vector<2x8x1xf32>
    %5 = vector.broadcast %4 : vector<2x8x1xf32> to vector<2x8x32xf32>
    %6 = arith.mulf %3, %5 : vector<2x8x32xf32>
    %c0_6 = arith.constant 0 : index
    %c0_7 = arith.constant 0 : index
    %7 = vector.load %arg6[%c0_6, %c0_7] : memref<2x32xf32, #tpu.memory_space<vmem>>, vector<2x32xf32>
    %cst = arith.constant dense<0.000000e+00> : vector<2x32xf32>
    %8 = vector.multi_reduction <add>, %6, %cst [1] : vector<2x8x32xf32> to vector<2x32xf32>
    %9 = arith.addf %7, %8 : vector<2x32xf32>
    %c0_8 = arith.constant 0 : index
    %c0_9 = arith.constant 0 : index
    %10 = vector.load %arg6[%c0_8, %c0_9] : memref<2x32xf32, #tpu.memory_space<vmem>>, vector<2x32xf32>
    tpu.vector_store %arg6[%c0_8, %c0_9], %9 {strides = array<i32>} : memref<2x32xf32, #tpu.memory_space<vmem>>, vector<2x32xf32>,
    %c0_i32_10 = arith.constant 0 : i32
    %11 = arith.cmpi eq, %arg1, %c0_i32_10 : i32
    %12 = arith.extui %11 : i1 to i32
    %c0_i32_11 = arith.constant 0 : i32
    %13 = arith.cmpi ne, %12, %c0_i32_11 : i32
    scf.if %13 {
      %c0_12 = arith.constant 0 : index
      %c0_13 = arith.constant 0 : index
      %14 = vector.load %arg6[%c0_12, %c0_13] : memref<2x32xf32, #tpu.memory_space<vmem>>, vector<2x32xf32>
      %c0_14 = arith.constant 0 : index
      %c0_15 = arith.constant 0 : index
      %15 = vector.load %arg4[%c0_14, %c0_15] : memref<32x128xf32, #tpu.memory_space<vmem>>, vector<32x128xf32>
      %cst_16 = arith.constant dense<0.000000e+00> : vector<2x128xf32>
      %16 = tpu.matmul %14, %15, %cst_16 {dimension_numbers = #tpu.dot_dimension_numbers<[1], [0], [0], [1], [0, 0, 1, 1], [], []>} : vector<2x32xf32>, vector<32x128xf32>, vector<2x128xf32> -> vector<2x128xf32>
      %c0_17 = arith.constant 0 : index
      %c0_18 = arith.constant 0 : index
      %17 = vector.load %arg5[%c0_17, %c0_18] : memref<2x128xf32, #tpu.memory_space<vmem>>, vector<2x128xf32>
      tpu.vector_store %arg5[%c0_17, %c0_18], %16 {strides = array<i32>} : memref<2x128xf32, #tpu.memory_space<vmem>>, vector<2x128xf32>,
    } else {
    }
    return
  }
  func.func @transform_0(%arg0: i32, %arg1: i32) -> (i32, i32, i32) {
    %c0_i32 = arith.constant 0 : i32
    %c0_i32_0 = arith.constant 0 : i32
    return %arg0, %arg1, %c0_i32 : i32, i32, i32
  }
  func.func @transform_1(%arg0: i32, %arg1: i32) -> (i32, i32, i32) {
    %c0_i32 = arith.constant 0 : i32
    %c0_i32_0 = arith.constant 0 : i32
    return %arg0, %arg1, %c0_i32 : i32, i32, i32
  }
  func.func @transform_2(%arg0: i32, %arg1: i32) -> (i32, i32) {
    %c0_i32 = arith.constant 0 : i32
    %c0_i32_0 = arith.constant 0 : i32
    %c0_i32_1 = arith.constant 0 : i32
    return %c0_i32, %c0_i32_0 : i32, i32
  }
  func.func @transform_3(%arg0: i32, %arg1: i32) -> (i32, i32) {
    %c0_i32 = arith.constant 0 : i32
    %c0_i32_0 = arith.constant 0 : i32
    return %arg0, %c0_i32 : i32, i32
  }
}

</mosaic_0001>

<bundles_post_ra>
// kernel: tpu_custom_call.1
= control target key start
LH: loop header
LB: loop body
LE: loop exit
PB: predicated region body
PF: predicated region fallthrough
CT: control target
= control target key end

     0   :  { %8 = vsyncpa [#allocation4], 0  ;;  %s321_s0 = inlined_call_operand.vmem [shape: f32[2,8,32], index: 0, kind: input, shape index: {}]   ;;  %s322_s1 = inlined_call_operand.vmem [shape: f32[2,8,1], index: 1, kind: input, shape index: {}]   ;;  %s323_s2 = inlined_call_operand.hbm [shape: f32[32,128], index: 2, kind: input, shape index: {}]   ;;  %s324_s3 = inlined_call_operand.hbm [shape: f32[2,128], index: 3, kind: output, shape index: {}]  }
   0x1   :  { %9 = vsyncpa [#allocation5], 0  ;;  %s252_s12 = smov [#allocation3]   ;;  %s204_s16 = scalar_lea.hbm %s323_s2, 512 }
   0x2   :  { %s19_s13 = sshll.u32 %s252_s12, 4  ;;  %p205_p0 = scmp.ne.s32.totalorder %s323_s2, %s204_s16  ;;  %s20_s13 = int_to_ptr.vmem [resolvable:$true] %s19_s13 }
   0x3   :  { %p208_p1 = scmp.lt.u32.totalorder %s204_s16, %s323_s2 }
   0x5   :  { %p210_p2 = pnand %p208_p1, %p205_p0 }
   0x7   :  { %213 = shalt.err (!%p210_p2)
}
   0x8   :  { %s214_s21 = scalar_lea.vmem %s20_s13, 512  ;;  %p219_p4 = scmp.lt.s32.totalorder %s20_s13, %s20_s13 }
   0x9   :  { %p215_p3 = scmp.ne.s32.totalorder %s20_s13, %s214_s21  ;;  %p220_p5 = scmp.lt.s32.totalorder %s214_s21, %s214_s21 }
   0xb   :  { %p221_p6 = por %p220_p5, %p219_p4 }
   0xd   :  { %p222_p7 = pnand %p221_p6, %p215_p3 }
   0xf   :  { %225 = shalt.err (!%p222_p7)
}
  0x10   :  { %s253_s22 = smov 128   ;;  %s254_s23 = smov 8  }
  0x11   :  { %25 = dma.hbm_to_vmem [thread:$0]  %s323_s2, 512, %s20_s13, [#allocation4], %s253_s22, %s253_s22, %s254_s23  }
  0x12   :  { %248 = dma.done.wait [#allocation4], 512  }
  0x13   :  { %249 = vsyncadd [#allocation4], 4294966784  ;;  %v255_v0 = vmov 0   ;;  %v37_v1 = vld [vmem:[%s322_s1] sm:$0xff]  ;;  %v38_v2 = vld [vmem:[%s322_s1 + $0x8] sm:$0xff]  ;;  %vm33_vm0 = vcmask 254976  }
  0x14   :  { %203 = vset.pattern.permute.xlu0 %v255_v0  ;;  %v256_v3 = vmov 0.0   ;;  %v79_v4 = vld [vmem:[#allocation3] sm:$0xff]  ;;  %v80_v5 = vld [vmem:[#allocation3 + $0x8] sm:$0xff]  ;;  %v81_v6 = vld [vmem:[#allocation3 + $0x10] sm:$0xff]  ;;  %v257_v7 = vmov 0.0|0.0   ;;  %vm258_vm1 = vmmov 0  }
  0x15   :  { %41 = vperm.xlu0 %203, %v37_v1   ;;  %34 = vst.msk [vmem:[#allocation2] sm:$0x3] %vm33_vm0, %v256_v3  ;;  %189 = vmatprep.subr.bf16.mxu0 %v257_v7  ;;  %v190_v8 = vpack.c.bf16 %v80_v5, %v79_v4  ;;  %v82_v9 = vld [vmem:[#allocation3 + $0x18] sm:$0xff]  ;;  %vm52_vm2 = vcmask 261120   ;;  %v36_v14 = vld [vmem:[%s321_s0 + $0x8] sm:$0xff]  ;;  %vm69_vm3 = vcmask 1041409  }
  0x16   :  { %v193_v10 = vpack.c.bf16 %v82_v9, %v81_v6  ;;  %186 = vmatprep.mubr.msk.f32.mxu0 %vm258_vm1, %v256_v3  ;;  %v35_v11 = vld [vmem:[%s321_s0] sm:$0xff]  ;;  %s259_s0 = smov [#allocation6]  }
  0x17   :  { %191 = vmatpush3.bf16.msra.mxu0 %v190_v8  ;;  %s163_s5 = sshll.u32 %s259_s0, 4  ;;  %s164_s5 = int_to_ptr.vmem [resolvable:$true] %s163_s5 }
  0x18   :  { %192 = vmatprep.subr.bf16.mxu0 %v257_v7  ;;  %s226_s6 = scalar_lea.vmem %s164_s5, 32  ;;  %p231_p9 = scmp.lt.s32.totalorder %s164_s5, %s164_s5 }
  0x19   :  { %46 = vperm.xlu0 %203, %v38_v2   ;;  %p227_p8 = scmp.ne.s32.totalorder %s164_s5, %s226_s6  ;;  %p232_p10 = scmp.lt.s32.totalorder %s226_s6, %s226_s6 }
  0x1b   :  { %194 = vmatpush3.bf16.msra.mxu0 %v193_v10  ;;  %p233_p11 = por %p232_p10, %p231_p9 }
  0x1c   :  { %v51_v31 = vld [vmem:[#allocation2] sm:$0x3] }
  0x1d   :  { %p234_p12 = pnand %p233_p11, %p227_p8 }
  0x94   :  { %v42_v12 = vpop.permute.xlu0 %41 }
  0x95   :  { %v49_v13 = vmul.f32 %v42_v12, %v35_v11 }
  0x97   :  { %v53_v15 = vsel %vm52_vm2, %v49_v13, 0.0 }
  0x98   :  { %v54_v16 = vrot.slane %v53_v15, 4  ;;  %v47_v17 = vpop.permute.xlu0 %46 }
  0x99   :  { %v50_v18 = vmul.f32 %v47_v17, %v36_v14 }
  0x9a   :  { %v55_v19 = vadd.f32 %v54_v16, %v53_v15 }
  0x9b   :  { %v60_v20 = vsel %vm52_vm2, %v50_v18, 0.0 }
  0x9c   :  { %v56_v21 = vrot.slane %v55_v19, 2  ;;  %v61_v22 = vrot.slane %v60_v20, 4 }
  0x9e   :  { %v57_v23 = vadd.f32 %v56_v21, %v55_v19  ;;  %v62_v24 = vadd.f32 %v61_v22, %v60_v20 }
  0xa0   :  { %v63_v25 = vrot.slane %v62_v24, 2  ;;  %v58_v26 = vrot.slane %v57_v23, 1 }
  0xa2   :  { %v64_v27 = vadd.f32 %v63_v25, %v62_v24  ;;  %v59_v29 = vadd.f32 %v58_v26, %v57_v23 }
  0xa4   :  { %v65_v28 = vrot.slane %v64_v27, 1 }
  0xa6   :  { %v66_v30 = vadd.f32 %v65_v28, %v64_v27 }
  0xa8   :  { %v70_v32 = vsel %vm69_vm3, %v66_v30, %v59_v29 }
  0xa9   :  { %v72_v33 = vadd.f32 %v70_v32, %v51_v31 }
  0xab   :  { %74 = vst.msk [vmem:[#allocation2] sm:$0x3] %vm33_vm0, %v72_v33 }
  0xb2   :  { %v78_v34 = vld [vmem:[#allocation2] sm:$0x3] }
  0xb3   :  { %187 = vmatmul.mubr.msk.f32.vlgmr.msra.gmra.mrb[0].mxu0 %vm52_vm2, %v78_v34 }
 0x186   :  { %v152_v35 = vpop.f32.mrb[0].mxu0 }
 0x187   :  { %156 = vst [vmem:[#allocation6] sm:$0x3] %v152_v35  ;;  %v188_v36 = vpop.f32.mrb[1].mxu0 }
 0x188   :  { %237 = shalt.err (!%p234_p12)
}
 0x189   :  { %s238_s9 = scalar_lea.hbm %s324_s3, 32 }
 0x18a   :  { %p239_p13 = scmp.ne.s32.totalorder %s324_s3, %s238_s9  ;;  %p242_p0 = scmp.lt.u32.totalorder %s238_s9, %s324_s3 }
 0x18c   :  { %p244_p1 = pnand %p242_p0, %p239_p13 }
 0x18e   :  { %247 = shalt.err (!%p244_p1)
}
 0x18f   :  { %166 = dma.vmem_to_hbm [thread:$0]  %s164_s5, 32, %s324_s3, [#allocation5]  }
 0x190   :  { %250 = dma.done.wait [#allocation5], 32  }
 0x191   :  { %251 = vsyncadd [#allocation5], 4294967264 }
 0x192   :  { %170 = vsyncpa [#allocation4], 1 }
 0x193   :  { %171 = vsyncpa [#allocation5], 1 }

</bundles_post_ra>
